<compile_context>
chip_gen: v7x
topology: tpu7x:2x2x1
jax: 0.10.0
libtpu: 0.0.40
codegen_flags: <defaults>
</compile_context>

<pallas_src>
import functools
import math

import jax
import jax.numpy as jnp
import numpy as np
from jax.experimental import pallas as pl
from jax.experimental.pallas import tpu as pltpu


# --------------------- kernel 1: LN1 + QKV projection + RoPE ---------------------
def qkv_rope_kernel(x_ref, cos_ref, sina_ref, sinb_ref, g_ref, beta_ref, wqkv_ref,
                    q_ref, k_ref, v_ref, *, D):
  eps = 1e-5
  x = x_ref[0].astype(jnp.float32)                        # (TL, D)

  mu = jnp.mean(x, axis=-1, keepdims=True)
  xc = x - mu
  var = jnp.mean(xc * xc, axis=-1, keepdims=True)
  h1 = xc * jax.lax.rsqrt(var + eps) * g_ref[...] + beta_ref[...]

  qkv = jnp.dot(h1.astype(jnp.bfloat16), wqkv_ref[...],
                preferred_element_type=jnp.float32)       # (TL, 3D) f32 acc
  q = qkv[:, :D]
  k = qkv[:, D:2 * D]
  v = qkv[:, 2 * D:]

  # Interleaved RoPE: out[2i]   = t[2i]*cos[2i]     - t[2i+1]*sin[2i]
  #                   out[2i+1] = t[2i+1]*cos[2i+1] + t[2i]  *sin[2i+1]
  # implemented with two lane rolls; the sign/parity masks are pre-folded into
  # sin_a (=-sin on even lanes, 0 on odd) and sin_b (=+sin on odd lanes, 0 on even),
  # so the wrap-around lanes of the rolls are multiplied by exactly zero.
  cos = cos_ref[...]
  sin_a = sina_ref[...]
  sin_b = sinb_ref[...]

  def rope(t):
    t_p1 = jnp.roll(t, D - 1, axis=1)   # t_p1[:, c] = t[:, (c+1) % D]
    t_m1 = jnp.roll(t, 1, axis=1)       # t_m1[:, c] = t[:, (c-1) % D]
    return t * cos + t_p1 * sin_a + t_m1 * sin_b

  q_ref[0] = rope(q).astype(q_ref.dtype)
  k_ref[0] = rope(k).astype(k_ref.dtype)
  v_ref[0] = v.astype(v_ref.dtype)


# --------------------- kernel 2: flash causal attention (all heads per step) -----
def flash_attn_kernel(q_ref, k_ref, v_ref, o_ref, m_sc, l_sc, acc_sc,
                      *, blk_q, blk_k, num_heads, head_dim, scale):
  i = pl.program_id(1)          # query tile index
  j = pl.program_id(2)          # kv tile index (reduction axis, innermost)

  @pl.when(j == 0)
  def _init():
    m_sc[...] = jnp.full(m_sc.shape, -jnp.inf, dtype=m_sc.dtype)
    l_sc[...] = jnp.zeros(l_sc.shape, dtype=l_sc.dtype)
    acc_sc[...] = jnp.zeros(acc_sc.shape, dtype=acc_sc.dtype)

  # Compute only kv tiles that intersect the causal lower triangle of this q tile
  # (the clamped kv index_map below also elides the DMA for the skipped tiles).
  @pl.when(j * blk_k <= i * blk_q + (blk_q - 1))
  def _compute():
    q = q_ref[0]                                          # (bq, D) bf16, all heads
    k = k_ref[0]                                          # (bk, D) bf16
    v = v_ref[0]                                          # (bk, D) bf16

    # Additive causal mask, built once per grid step and shared by every head.
    row = i * blk_q + jax.lax.broadcasted_iota(jnp.int32, (blk_q, blk_k), 0)
    col = j * blk_k + jax.lax.broadcasted_iota(jnp.int32, (blk_q, blk_k), 1)
    neg = jnp.where(row >= col, 0.0, -1e30).astype(jnp.float32)

    for h in range(num_heads):                            # static unroll
      sl = slice(h * head_dim, (h + 1) * head_dim)
      qh = q[:, sl]
      kh = k[:, sl]
      vh = v[:, sl]

      s = jax.lax.dot_general(qh, kh, (((1,), (1,)), ((), ())),
                              preferred_element_type=jnp.float32) * scale + neg

      m_prev = m_sc[h]                                    # (bq, 1)
      m_new = jnp.maximum(m_prev, jnp.max(s, axis=-1, keepdims=True))
      alpha = jnp.exp(m_prev - m_new)
      p = jnp.exp(s - m_new)
      l_sc[h] = alpha * l_sc[h] + jnp.sum(p, axis=-1, keepdims=True)
      acc_sc[h] = alpha * acc_sc[h] + jnp.dot(p.astype(vh.dtype), vh,
                                              preferred_element_type=jnp.float32)
      m_sc[h] = m_new

  @pl.when(j == pl.num_programs(2) - 1)
  def _finalize():
    outs = [acc_sc[h] / l_sc[h] for h in range(num_heads)]
    # Single lane-dense (width D) store for the whole q tile.
    o_ref[0] = jnp.concatenate(outs, axis=-1).astype(o_ref.dtype)


# ---------- kernel 3: out-proj + residual + LN2 + FFN (SiLU) + residual ----------
def proj_ffn_kernel(x_ref, attn_ref, wo_ref, bo_ref, ln2g_ref, ln2b_ref,
                    w1_ref, b1_ref, w2_ref, b2_ref, out_ref):
  eps = 1e-5
  x = x_ref[0].astype(jnp.float32)                        # (TL, D)
  a = attn_ref[0]                                         # (TL, D) bf16

  proj = jnp.dot(a, wo_ref[...], preferred_element_type=jnp.float32) + bo_ref[...]
  x2 = x + proj

  mu = jnp.mean(x2, axis=-1, keepdims=True)
  xc = x2 - mu
  var = jnp.mean(xc * xc, axis=-1, keepdims=True)
  h2 = xc * jax.lax.rsqrt(var + eps) * ln2g_ref[...] + ln2b_ref[...]

  f = jnp.dot(h2.astype(jnp.bfloat16), w1_ref[...],
              preferred_element_type=jnp.float32) + b1_ref[...]
  f = f * jax.nn.sigmoid(f)                               # SiLU (exp on EUP)
  f = jnp.dot(f.astype(jnp.bfloat16), w2_ref[...],
              preferred_element_type=jnp.float32) + b2_ref[...]

  out_ref[0] = (x2 + f).astype(out_ref.dtype)


# ------------------------------------ wrapper ------------------------------------
def _vmem_limit_bytes():
  # Generation-aware VMEM budget (v5e/v6e: 128 MiB physical, v7x: 64 MiB), headroom kept.
  try:
    cap = pltpu.get_tpu_info().vmem_capacity_bytes
    return int(min(cap - 16 * 1024 * 1024, 110 * 1024 * 1024))
  except Exception:
    return 64 * 1024 * 1024


def transformer_block(x, cos_full, sin_a, sin_b, params, num_heads,
                      *, block_l=256, block_q=256, block_kv=256):
  B, L, D = x.shape
  H = num_heads
  assert D % H == 0
  hd = D // H
  assert hd % 2 == 0
  FF = params["w1"].shape[1]

  bl = min(block_l, L)
  bq = min(block_q, L)
  bk = min(block_kv, L)
  assert L % bl == 0 and L % bq == 0 and L % bk == 0

  bf16 = jnp.bfloat16
  wqkv = params["wqkv"].astype(bf16)
  wo = params["wo"].astype(bf16)
  w1 = params["w1"].astype(bf16)
  w2 = params["w2"].astype(bf16)

  vmem_limit = _vmem_limit_bytes()

  # ---- kernel 1: LN1 + QKV + RoPE.  Grid (L-tiles, batch) with batch innermost so the
  # position-dependent RoPE tables keep the same block index across consecutive steps
  # (their re-DMA is elided). ----
  q, k, v = pl.pallas_call(
      functools.partial(qkv_rope_kernel, D=D),
      grid=(L // bl, B),
      in_specs=[
          pl.BlockSpec((1, bl, D), lambda i, b: (b, i, 0)),     # x tile
          pl.BlockSpec((bl, D), lambda i, b: (i, 0)),           # cos
          pl.BlockSpec((bl, D), lambda i, b: (i, 0)),           # sin_a
          pl.BlockSpec((bl, D), lambda i, b: (i, 0)),           # sin_b
          pl.BlockSpec((1, D), lambda i, b: (0, 0)),            # ln1 gamma
          pl.BlockSpec((1, D), lambda i, b: (0, 0)),            # ln1 beta
          pl.BlockSpec((D, 3 * D), lambda i, b: (0, 0)),        # wqkv (bf16)
      ],
      out_specs=[pl.BlockSpec((1, bl, D), lambda i, b: (b, i, 0))] * 3,
      out_shape=[jax.ShapeDtypeStruct((B, L, D), bf16)] * 3,
      compiler_params=pltpu.CompilerParams(
          dimension_semantics=("parallel", "parallel"),
          vmem_limit_bytes=vmem_limit),
  )(x, cos_full, sin_a, sin_b, params["ln1_g"], params["ln1_b"], wqkv)

  # ---- kernel 2: flash attention.  q/k/v stay (B, L, D); heads are sliced from lanes
  # inside the kernel, so there are no HBM-level head transposes, every kv fetch is
  # shared by all heads, and the output store is lane-dense. ----
  scale = 1.0 / math.sqrt(hd)

  def q_map(b, i, j):
    return (b, i, 0)

  def kv_map(b, i, j):
    # Clamp to the last kv tile this query tile needs: once j passes the causal
    # diagonal the block index repeats, so Pallas elides the (useless) DMA.
    return (b, jnp.minimum(j, (i * bq + bq - 1) // bk), 0)

  attn = pl.pallas_call(
      functools.partial(flash_attn_kernel, blk_q=bq, blk_k=bk,
                        num_heads=H, head_dim=hd, scale=scale),
      grid=(B, L // bq, L // bk),
      in_specs=[
          pl.BlockSpec((1, bq, D), q_map),
          pl.BlockSpec((1, bk, D), kv_map),
          pl.BlockSpec((1, bk, D), kv_map),
      ],
      out_specs=pl.BlockSpec((1, bq, D), q_map),
      out_shape=jax.ShapeDtypeStruct((B, L, D), bf16),
      scratch_shapes=[
          pltpu.VMEM((H, bq, 1), jnp.float32),     # running max m, per head
          pltpu.VMEM((H, bq, 1), jnp.float32),     # running sum l, per head
          pltpu.VMEM((H, bq, hd), jnp.float32),    # output accumulator, per head
      ],
      compiler_params=pltpu.CompilerParams(
          dimension_semantics=("parallel", "parallel", "arbitrary"),
          vmem_limit_bytes=vmem_limit),
  )(q, k, v)

  # ---- kernel 3: out-proj + residual + LN2 + FFN + residual (per L-tile) ----
  out = pl.pallas_call(
      proj_ffn_kernel,
      grid=(B, L // bl),
      in_specs=[
          pl.BlockSpec((1, bl, D), lambda b, i: (b, i, 0)),     # x tile (residual)
          pl.BlockSpec((1, bl, D), lambda b, i: (b, i, 0)),     # attention output tile
          pl.BlockSpec((D, D), lambda b, i: (0, 0)),            # wo (bf16)
          pl.BlockSpec((1, D), lambda b, i: (0, 0)),            # bo
          pl.BlockSpec((1, D), lambda b, i: (0, 0)),            # ln2 gamma
          pl.BlockSpec((1, D), lambda b, i: (0, 0)),            # ln2 beta
          pl.BlockSpec((D, FF), lambda b, i: (0, 0)),           # w1 (bf16)
          pl.BlockSpec((1, FF), lambda b, i: (0, 0)),           # b1
          pl.BlockSpec((FF, D), lambda b, i: (0, 0)),           # w2 (bf16)
          pl.BlockSpec((1, D), lambda b, i: (0, 0)),            # b2
      ],
      out_specs=pl.BlockSpec((1, bl, D), lambda b, i: (b, i, 0)),
      out_shape=jax.ShapeDtypeStruct((B, L, D), x.dtype),
      compiler_params=pltpu.CompilerParams(
          dimension_semantics=("parallel", "parallel"),
          vmem_limit_bytes=vmem_limit),
  )(x, attn, wo, params["bo"], params["ln2_g"], params["ln2_b"],
    w1, params["b1"], w2, params["b2"])
  return out


# ----------------------- pure-JAX reference (for checking) -----------------------
def _layernorm(x, g, b, eps=1e-5):
  mu = jnp.mean(x, axis=-1, keepdims=True)
  var = jnp.mean((x - mu) ** 2, axis=-1, keepdims=True)
  return (x - mu) * jax.lax.rsqrt(var + eps) * g + b


def _rope_ref(t, cos, sin):  # t: (B, L, H, hd); cos/sin: (L, hd//2)
  tr = t[..., 0::2]
  ti = t[..., 1::2]
  c = cos[None, :, None, :]
  s = sin[None, :, None, :]
  o_r = tr * c - ti * s
  o_i = tr * s + ti * c
  return jnp.stack([o_r, o_i], axis=-1).reshape(t.shape)


def reference_block(x, cos, sin, params, num_heads):
  B, L, D = x.shape
  H = num_heads
  hd = D // H
  h1 = _layernorm(x, params["ln1_g"][0], params["ln1_b"][0])
  qkv = h1 @ params["wqkv"]
  q, k, v = qkv[..., :D], qkv[..., D:2 * D], qkv[..., 2 * D:]
  q = q.reshape(B, L, H, hd)
  k = k.reshape(B, L, H, hd)
  v = v.reshape(B, L, H, hd)
  q = _rope_ref(q, cos, sin)
  k = _rope_ref(k, cos, sin)
  q = q.transpose(0, 2, 1, 3)  # (B,H,L,hd)
  k = k.transpose(0, 2, 1, 3)
  v = v.transpose(0, 2, 1, 3)
  scores = (q @ k.swapaxes(-1, -2)) / math.sqrt(hd)
  mask = jnp.tril(jnp.ones((L, L), dtype=bool))
  scores = jnp.where(mask, scores, -jnp.inf)
  p = jax.nn.softmax(scores, axis=-1)
  o = (p @ v).transpose(0, 2, 1, 3).reshape(B, L, D)
  o = o @ params["wo"] + params["bo"][0]
  x2 = x + o
  h2 = _layernorm(x2, params["ln2_g"][0], params["ln2_b"][0])
  f = h2 @ params["w1"] + params["b1"][0]
  f = jax.nn.silu(f)
  f = f @ params["w2"] + params["b2"][0]
  return x2 + f


if __name__ == "__main__":
  B, L, D, H, FF = 2, 8, 32, 4, 64
  hd = D // H

  key = jax.random.PRNGKey(0)
  keys = jax.random.split(key, 8)

  x = jax.random.normal(keys[0], (B, L, D), dtype=jnp.float32)

  params = {
      "ln1_g": jnp.ones((1, D), jnp.float32),
      "ln1_b": jnp.zeros((1, D), jnp.float32),
      "wqkv": 0.05 * jax.random.normal(keys[1], (D, 3 * D), jnp.float32),
      "wo":   0.05 * jax.random.normal(keys[2], (D, D), jnp.float32),
      "bo":   0.01 * jax.random.normal(keys[3], (1, D), jnp.float32),
      "ln2_g": jnp.ones((1, D), jnp.float32),
      "ln2_b": jnp.zeros((1, D), jnp.float32),
      "w1":   0.05 * jax.random.normal(keys[4], (D, FF), jnp.float32),
      "b1":   0.01 * jax.random.normal(keys[5], (1, FF), jnp.float32),
      "w2":   0.05 * jax.random.normal(keys[6], (FF, D), jnp.float32),
      "b2":   0.01 * jax.random.normal(keys[7], (1, D), jnp.float32),
  }

  # RoPE tables: freqs_cis equivalent of shape (L, hd//2) represented as cos/sin.
  theta = 10000.0
  inv_freq = 1.0 / (theta ** (np.arange(0, hd, 2, dtype=np.float32) / hd))  # (hd//2,)
  t = np.arange(L, dtype=np.float32)
  angles = np.outer(t, inv_freq)                       # (L, hd//2)
  cos = jnp.asarray(np.cos(angles))
  sin = jnp.asarray(np.sin(angles))

  # Expanded tables for the kernel: interleave pairs, tile across heads -> (L, D),
  # with the rotation's sign/parity masks folded into sin_a / sin_b.
  cos_np = np.tile(np.repeat(np.cos(angles), 2, axis=1), (1, H)).astype(np.float32)
  sin_np = np.tile(np.repeat(np.sin(angles), 2, axis=1), (1, H)).astype(np.float32)
  parity = (np.arange(D) % 2).astype(np.float32)       # 0 on even lanes, 1 on odd lanes
  sin_a_np = (-sin_np * (1.0 - parity)).astype(np.float32)
  sin_b_np = (sin_np * parity).astype(np.float32)

  cos_full = jnp.asarray(cos_np)
  sin_a = jnp.asarray(sin_a_np)
  sin_b = jnp.asarray(sin_b_np)

  out = transformer_block(x, cos_full, sin_a, sin_b, params, H)
  out = jax.block_until_ready(out)

  ref = reference_block(x, cos, sin, params, H)
  # bf16 matmul operands -> compare at bf16-level tolerance.
  np.testing.assert_allclose(np.asarray(out), np.asarray(ref), rtol=2e-2, atol=2e-2)

  print("KERNEL_OK")
</pallas_src>

<mosaic_0001>
module attributes {stable_mosaic.version = 11 : i64} {
  func.func @qkv_rope_kernel(%arg0: i32, %arg1: i32, %arg2: memref<1x8x32xf32, #tpu.memory_space<vmem>>, %arg3: memref<8x32xf32, #tpu.memory_space<vmem>>, %arg4: memref<8x32xf32, #tpu.memory_space<vmem>>, %arg5: memref<8x32xf32, #tpu.memory_space<vmem>>, %arg6: memref<1x32xf32, #tpu.memory_space<vmem>>, %arg7: memref<1x32xf32, #tpu.memory_space<vmem>>, %arg8: memref<32x96xbf16, #tpu.memory_space<vmem>>, %arg9: memref<1x8x32xbf16, #tpu.memory_space<vmem>>, %arg10: memref<1x8x32xbf16, #tpu.memory_space<vmem>>, %arg11: memref<1x8x32xbf16, #tpu.memory_space<vmem>>) attributes {dimension_semantics = [#tpu.dimension_semantics<parallel>, #tpu.dimension_semantics<parallel>], iteration_bounds = array<i64: 1, 2>, scalar_prefetch = 0 : i64, scratch_operands = 0 : i64, tpu.core_type = #tpu.core_type<tc>, window_params = [{transform_indices = @transform_0, window_bounds = array<i64: 1, 8, 32>}, {transform_indices = @transform_1, window_bounds = array<i64: 8, 32>}, {transform_indices = @transform_2, window_bounds = array<i64: 8, 32>}, {transform_indices = @transform_3, window_bounds = array<i64: 8, 32>}, {pipeline_mode = #tpu.pipeline_mode<synchronous>, transform_indices = @transform_4, window_bounds = array<i64: 1, 32>}, {pipeline_mode = #tpu.pipeline_mode<synchronous>, transform_indices = @transform_5, window_bounds = array<i64: 1, 32>}, {pipeline_mode = #tpu.pipeline_mode<synchronous>, transform_indices = @transform_6, window_bounds = array<i64: 32, 96>}, {transform_indices = @transform_7, window_bounds = array<i64: 1, 8, 32>}, {transform_indices = @transform_8, window_bounds = array<i64: 1, 8, 32>}, {transform_indices = @transform_9, window_bounds = array<i64: 1, 8, 32>}]} {
    %c0 = arith.constant 0 : index
    %c0_0 = arith.constant 0 : index
    %c0_1 = arith.constant 0 : index
    %0 = vector.load %arg2[%c0, %c0_0, %c0_1] : memref<1x8x32xf32, #tpu.memory_space<vmem>>, vector<1x8x32xf32>
    %1 = vector.shape_cast %0 : vector<1x8x32xf32> to vector<8x32xf32>
    %cst = arith.constant dense<0.000000e+00> : vector<8xf32>
    %2 = vector.multi_reduction <add>, %1, %cst [1] : vector<8x32xf32> to vector<8xf32>
    %3 = vector.shape_cast %2 : vector<8xf32> to vector<8x1xf32>
    %cst_2 = arith.constant 3.200000e+01 : f32
    %4 = vector.broadcast %cst_2 : f32 to vector<8x1xf32>
    %5 = arith.divf %3, %4 : vector<8x1xf32>
    %6 = vector.broadcast %5 : vector<8x1xf32> to vector<8x32xf32>
    %7 = arith.subf %1, %6 : vector<8x32xf32>
    %8 = arith.mulf %7, %7 : vector<8x32xf32>
    %cst_3 = arith.constant dense<0.000000e+00> : vector<8xf32>
    %9 = vector.multi_reduction <add>, %8, %cst_3 [1] : vector<8x32xf32> to vector<8xf32>
    %10 = vector.shape_cast %9 : vector<8xf32> to vector<8x1xf32>
    %cst_4 = arith.constant 3.200000e+01 : f32
    %11 = vector.broadcast %cst_4 : f32 to vector<8x1xf32>
    %12 = arith.divf %10, %11 : vector<8x1xf32>
    %cst_5 = arith.constant 9.99999974E-6 : f32
    %13 = vector.broadcast %cst_5 : f32 to vector<8x1xf32>
    %14 = arith.addf %12, %13 : vector<8x1xf32>
    %15 = math.rsqrt %14 : vector<8x1xf32>
    %16 = vector.broadcast %15 : vector<8x1xf32> to vector<8x32xf32>
    %17 = arith.mulf %7, %16 : vector<8x32xf32>
    %c0_6 = arith.constant 0 : index
    %c0_7 = arith.constant 0 : index
    %18 = vector.load %arg6[%c0_6, %c0_7] : memref<1x32xf32, #tpu.memory_space<vmem>>, vector<1x32xf32>
    %19 = vector.broadcast %18 : vector<1x32xf32> to vector<8x32xf32>
    %20 = arith.mulf %17, %19 : vector<8x32xf32>
    %c0_8 = arith.constant 0 : index
    %c0_9 = arith.constant 0 : index
    %21 = vector.load %arg7[%c0_8, %c0_9] : memref<1x32xf32, #tpu.memory_space<vmem>>, vector<1x32xf32>
    %22 = vector.broadcast %21 : vector<1x32xf32> to vector<8x32xf32>
    %23 = arith.addf %20, %22 : vector<8x32xf32>
    %24 = arith.truncf %23 : vector<8x32xf32> to vector<8x32xbf16>
    %c0_10 = arith.constant 0 : index
    %c0_11 = arith.constant 0 : index
    %25 = vector.load %arg8[%c0_10, %c0_11] : memref<32x96xbf16, #tpu.memory_space<vmem>>, vector<32x96xbf16>
    %cst_12 = arith.constant dense<0.000000e+00> : vector<8x96xf32>
    %26 = tpu.matmul %24, %25, %cst_12 {dimension_numbers = #tpu.dot_dimension_numbers<[1], [0], [0], [1], [0, 0, 1, 1], [], []>} : vector<8x32xbf16>, vector<32x96xbf16>, vector<8x96xf32> -> vector<8x96xf32>
    %27 = vector.extract_strided_slice %26 {offsets = [0, 0], sizes = [8, 32], strides = [1, 1]} : vector<8x96xf32> to vector<8x32xf32>
    %28 = vector.extract_strided_slice %26 {offsets = [0, 32], sizes = [8, 32], strides = [1, 1]} : vector<8x96xf32> to vector<8x32xf32>
    %29 = vector.extract_strided_slice %26 {offsets = [0, 64], sizes = [8, 32], strides = [1, 1]} : vector<8x96xf32> to vector<8x32xf32>
    %c0_13 = arith.constant 0 : index
    %c0_14 = arith.constant 0 : index
    %30 = vector.load %arg3[%c0_13, %c0_14] : memref<8x32xf32, #tpu.memory_space<vmem>>, vector<8x32xf32>
    %c0_15 = arith.constant 0 : index
    %c0_16 = arith.constant 0 : index
    %31 = vector.load %arg4[%c0_15, %c0_16] : memref<8x32xf32, #tpu.memory_space<vmem>>, vector<8x32xf32>
    %c0_17 = arith.constant 0 : index
    %c0_18 = arith.constant 0 : index
    %32 = vector.load %arg5[%c0_17, %c0_18] : memref<8x32xf32, #tpu.memory_space<vmem>>, vector<8x32xf32>
    %33 = vector.extract_strided_slice %27 {offsets = [0, 1], sizes = [8, 31], strides = [1, 1]} : vector<8x32xf32> to vector<8x31xf32>
    %34 = vector.extract_strided_slice %27 {offsets = [0, 0], sizes = [8, 1], strides = [1, 1]} : vector<8x32xf32> to vector<8x1xf32>
    %35 = tpu.concatenate %33, %34 in 1 : vector<8x31xf32>, vector<8x1xf32> -> vector<8x32xf32>
    %36 = vector.extract_strided_slice %27 {offsets = [0, 31], sizes = [8, 1], strides = [1, 1]} : vector<8x32xf32> to vector<8x1xf32>
    %37 = vector.extract_strided_slice %27 {offsets = [0, 0], sizes = [8, 31], strides = [1, 1]} : vector<8x32xf32> to vector<8x31xf32>
    %38 = tpu.concatenate %36, %37 in 1 : vector<8x1xf32>, vector<8x31xf32> -> vector<8x32xf32>
    %39 = arith.mulf %27, %30 : vector<8x32xf32>
    %40 = arith.mulf %35, %31 : vector<8x32xf32>
    %41 = arith.addf %39, %40 : vector<8x32xf32>
    %42 = arith.mulf %38, %32 : vector<8x32xf32>
    %43 = arith.addf %41, %42 : vector<8x32xf32>
    %44 = arith.truncf %43 : vector<8x32xf32> to vector<8x32xbf16>
    %c0_19 = arith.constant 0 : index
    %c0_20 = arith.constant 0 : index
    %c0_21 = arith.constant 0 : index
    %45 = vector.load %arg9[%c0_19, %c0_20, %c0_21] : memref<1x8x32xbf16, #tpu.memory_space<vmem>>, vector<1x8x32xbf16>
    %46 = vector.shape_cast %45 : vector<1x8x32xbf16> to vector<8x32xbf16>
    %47 = vector.shape_cast %44 : vector<8x32xbf16> to vector<1x8x32xbf16>
    tpu.vector_store %arg9[%c0_19, %c0_20, %c0_21], %47 {strides = array<i32>} : memref<1x8x32xbf16, #tpu.memory_space<vmem>>, vector<1x8x32xbf16>,
    %48 = vector.extract_strided_slice %28 {offsets = [0, 1], sizes = [8, 31], strides = [1, 1]} : vector<8x32xf32> to vector<8x31xf32>
    %49 = vector.extract_strided_slice %28 {offsets = [0, 0], sizes = [8, 1], strides = [1, 1]} : vector<8x32xf32> to vector<8x1xf32>
    %50 = tpu.concatenate %48, %49 in 1 : vector<8x31xf32>, vector<8x1xf32> -> vector<8x32xf32>
    %51 = vector.extract_strided_slice %28 {offsets = [0, 31], sizes = [8, 1], strides = [1, 1]} : vector<8x32xf32> to vector<8x1xf32>
    %52 = vector.extract_strided_slice %28 {offsets = [0, 0], sizes = [8, 31], strides = [1, 1]} : vector<8x32xf32> to vector<8x31xf32>
    %53 = tpu.concatenate %51, %52 in 1 : vector<8x1xf32>, vector<8x31xf32> -> vector<8x32xf32>
    %54 = arith.mulf %28, %30 : vector<8x32xf32>
    %55 = arith.mulf %50, %31 : vector<8x32xf32>
    %56 = arith.addf %54, %55 : vector<8x32xf32>
    %57 = arith.mulf %53, %32 : vector<8x32xf32>
    %58 = arith.addf %56, %57 : vector<8x32xf32>
    %59 = arith.truncf %58 : vector<8x32xf32> to vector<8x32xbf16>
    %c0_22 = arith.constant 0 : index
    %c0_23 = arith.constant 0 : index
    %c0_24 = arith.constant 0 : index
    %60 = vector.load %arg10[%c0_22, %c0_23, %c0_24] : memref<1x8x32xbf16, #tpu.memory_space<vmem>>, vector<1x8x32xbf16>
    %61 = vector.shape_cast %60 : vector<1x8x32xbf16> to vector<8x32xbf16>
    %62 = vector.shape_cast %59 : vector<8x32xbf16> to vector<1x8x32xbf16>
    tpu.vector_store %arg10[%c0_22, %c0_23, %c0_24], %62 {strides = array<i32>} : memref<1x8x32xbf16, #tpu.memory_space<vmem>>, vector<1x8x32xbf16>,
    %63 = arith.truncf %29 : vector<8x32xf32> to vector<8x32xbf16>
    %c0_25 = arith.constant 0 : index
    %c0_26 = arith.constant 0 : index
    %c0_27 = arith.constant 0 : index
    %64 = vector.load %arg11[%c0_25, %c0_26, %c0_27] : memref<1x8x32xbf16, #tpu.memory_space<vmem>>, vector<1x8x32xbf16>
    %65 = vector.shape_cast %64 : vector<1x8x32xbf16> to vector<8x32xbf16>
    %66 = vector.shape_cast %63 : vector<8x32xbf16> to vector<1x8x32xbf16>
    tpu.vector_store %arg11[%c0_25, %c0_26, %c0_27], %66 {strides = array<i32>} : memref<1x8x32xbf16, #tpu.memory_space<vmem>>, vector<1x8x32xbf16>,
    return
  }
  func.func @transform_0(%arg0: i32, %arg1: i32) -> (i32, i32, i32) {
    %c0_i32 = arith.constant 0 : i32
    %c0_i32_0 = arith.constant 0 : i32
    return %arg1, %arg0, %c0_i32 : i32, i32, i32
  }
  func.func @transform_1(%arg0: i32, %arg1: i32) -> (i32, i32) {
    %c0_i32 = arith.constant 0 : i32
    %c0_i32_0 = arith.constant 0 : i32
    return %arg0, %c0_i32 : i32, i32
  }
  func.func @transform_2(%arg0: i32, %arg1: i32) -> (i32, i32) {
    %c0_i32 = arith.constant 0 : i32
    %c0_i32_0 = arith.constant 0 : i32
    return %arg0, %c0_i32 : i32, i32
  }
  func.func @transform_3(%arg0: i32, %arg1: i32) -> (i32, i32) {
    %c0_i32 = arith.constant 0 : i32
    %c0_i32_0 = arith.constant 0 : i32
    return %arg0, %c0_i32 : i32, i32
  }
  func.func @transform_4(%arg0: i32, %arg1: i32) -> (i32, i32) {
    %c0_i32 = arith.constant 0 : i32
    %c0_i32_0 = arith.constant 0 : i32
    %c0_i32_1 = arith.constant 0 : i32
    return %c0_i32, %c0_i32_0 : i32, i32
  }
  func.func @transform_5(%arg0: i32, %arg1: i32) -> (i32, i32) {
    %c0_i32 = arith.constant 0 : i32
    %c0_i32_0 = arith.constant 0 : i32
    %c0_i32_1 = arith.constant 0 : i32
    return %c0_i32, %c0_i32_0 : i32, i32
  }
  func.func @transform_6(%arg0: i32, %arg1: i32) -> (i32, i32) {
    %c0_i32 = arith.constant 0 : i32
    %c0_i32_0 = arith.constant 0 : i32
    %c0_i32_1 = arith.constant 0 : i32
    return %c0_i32, %c0_i32_0 : i32, i32
  }
  func.func @transform_7(%arg0: i32, %arg1: i32) -> (i32, i32, i32) {
    %c0_i32 = arith.constant 0 : i32
    %c0_i32_0 = arith.constant 0 : i32
    return %arg1, %arg0, %c0_i32 : i32, i32, i32
  }
  func.func @transform_8(%arg0: i32, %arg1: i32) -> (i32, i32, i32) {
    %c0_i32 = arith.constant 0 : i32
    %c0_i32_0 = arith.constant 0 : i32
    return %arg1, %arg0, %c0_i32 : i32, i32, i32
  }
  func.func @transform_9(%arg0: i32, %arg1: i32) -> (i32, i32, i32) {
    %c0_i32 = arith.constant 0 : i32
    %c0_i32_0 = arith.constant 0 : i32
    return %arg1, %arg0, %c0_i32 : i32, i32, i32
  }
}

</mosaic_0001>

<bundles_post_ra>
// kernel: tpu_custom_call.1
= control target key start
LH: loop header
LB: loop body
LE: loop exit
PB: predicated region body
PF: predicated region fallthrough
CT: control target
= control target key end

     0   :  { %s1953_s0 = inlined_call_operand.hbm [shape: f32[2,8,32], index: 0, kind: input, shape index: {}]   ;;  %s1954_s1 = inlined_call_operand.hbm [shape: f32[8,32], index: 1, kind: input, shape index: {}]   ;;  %s1955_s2 = inlined_call_operand.hbm [shape: f32[8,32], index: 2, kind: input, shape index: {}]   ;;  %s1956_s3 = inlined_call_operand.hbm [shape: f32[8,32], index: 3, kind: input, shape index: {}]   ;;  %s1957_s4 = inlined_call_operand.hbm [shape: f32[1,32], index: 4, kind: input, shape index: {}]   ;;  %s1958_s5 = inlined_call_operand.hbm [shape: f32[1,32], index: 5, kind: input, shape index: {}]   ;;  %s1959_s6 = inlined_call_operand.hbm [shape: bf16[32,96], index: 6, kind: input, shape index: {}]   ;;  %s1960_s7 = inlined_call_operand.hbm [shape: bf16[2,8,32], index: 7, kind: output, shape index: {0}]   ;;  %s1961_s8 = inlined_call_operand.hbm [shape: bf16[2,8,32], index: 8, kind: output, shape index: {1}]   ;;  %s1962_s9 = inlined_call_operand.hbm [shape: bf16[2,8,32], index: 9, kind: output, shape index: {2}]  }
   0x1   :  { %1968 = sst [smem:[#allocation24_spill]] %s1953_s0 }
   0x2   :  { %1969 = sst [smem:[#allocation25_spill]] %s1954_s1 }
   0x3   :  { %1970 = sst [smem:[#allocation26_spill]] %s1955_s2 }
   0x4   :  { %1971 = sst [smem:[#allocation27_spill]] %s1956_s3 }
   0x5   :  { %1972 = sst [smem:[#allocation28_spill]] %s1962_s9 }
   0x6   :  { %15 = vsyncpa [#allocation3], 0 }
   0x7   :  { %17 = vsyncpa [#allocation3 + $0x1], 0 }
   0x8   :  { %18 = vsyncpa [#allocation6], 0 }
   0x9   :  { %19 = vsyncpa [#allocation9], 0 }
   0xa   :  { %20 = vsyncpa [#allocation12], 0 }
   0xb   :  { %21 = vsyncpa [#allocation4], 0 }
   0xc   :  { %23 = vsyncpa [#allocation4 + $0x1], 0 }
   0xd   :  { %24 = vsyncpa [#allocation16], 0 }
   0xe   :  { %26 = vsyncpa [#allocation16 + $0x1], 0  ;;  %s1534_s30 = smov 0   ;;  %s1536_s10 = smov 0  }
   0xf   :  { %s1538_s11 = smov 0   ;;  %s1540_s12 = smov 0  }
  0x10   :  { %s1542_s13 = smov 0   ;;  %s1544_s14 = smov 0  }
  0x11 LB: > { %s1565_s15 = sadd.s32 4294967295, %s1459_s14   ;;  %p908_p0 = scmp.ge.s32.totalorder %s1459_s14, 1  ;;  %s1459_s14 = sphi %s1544_s14, %s32_s14   ;;  %s1455_s13 = sphi %s1542_s13, %s2002_s13   ;;  %s1451_s12 = sphi %s1540_s12, %s2001_s12   ;;  %s1447_s11 = sphi %s1538_s11, %s2000_s11   ;;  %s1443_s10 = sphi %s1536_s10, %s1999_s10   ;;  %s1439_s30 = sphi %s1534_s30, %s1998_s30  }
  0x12   : > { %p1963_p1 = scmp.eq.s32.totalorder %s1565_s15, 0  ;;  %p302_p2 = scmp.lt.s32.totalorder %s1459_s14, 3 }
  0x13   : > { %s1461_s17 = smov [#allocation5]   ;;  %s1462_s19 = smov [#allocation8]  }
  0x14   : > { %p1570_p3 = pnand %p908_p0, %p302_p2  ;;  %s317_s18 = sshll.u32 %s1461_s17, 4  ;;  %s318_s18 = int_to_ptr.vmem [resolvable:$true] %s317_s18 }
  0x15   : > { %s343_s20 = sshll.u32 %s1462_s19, 4  ;;  %s1463_s22 = smov [#allocation11]   ;;  %s1583_s20 = int_to_ptr.vmem [resolvable:$true] %s343_s20 }
  0x16   : > { %s1973_s16 = scalar_select %p1570_p3, 1, 0 }
  0x17   : > { %p989_p5 = pneg %p1570_p3  ;;  %s365_s23 = sshll.u32 %s1463_s22, 4  ;;  %s1585_s23 = int_to_ptr.vmem [resolvable:$true] %s365_s23 }
  0x18   : > { %s1975_s1 = sld [smem:[#allocation25_spill]] }
  0x19   : > { %p1579_p6 = pnand %p989_p5, %p1963_p1 }
  0x1b   : > { %p1595_p8 = pneg %p1579_p6 }
  0x1e   : > { %s1107_s26 = scalar_lea.hbm %s1975_s1, 128 }
  0x1f   : > { %p1108_p7 = scmp.ne.s32.totalorder %s1975_s1, %s1107_s26  ;;  %p1114_p11 = scmp.lt.u32.totalorder %s1107_s26, %s1975_s1 }
  0x21   : > { %p1110_p9 = pnand %p1595_p8, %p1108_p7 }
  0x23   : > { %p1111_p10 = pneg %p1110_p9 }
  0x25   : > { %p1116_p12 = pnand %p1114_p11, %p1111_p10 }
  0x27   : > { %1119 = shalt.err (!%p1116_p12)
}
  0x28   : > { %s1120_s22 = scalar_lea.vmem %s318_s18, 128  ;;  %p1128_p5 = scmp.lt.s32.totalorder %s318_s18, %s318_s18 }
  0x29   : > { %p1121_p13 = scmp.ne.s32.totalorder %s318_s18, %s1120_s22  ;;  %p1129_p4 = scmp.lt.s32.totalorder %s1120_s22, %s1120_s22 }
  0x2b   : > { %p1123_p0 = pnand %p1121_p13, %p1595_p8  ;;  %p1130_p1 = por %p1129_p4, %p1128_p5 }
  0x2d   : > { %p1124_p2 = pneg %p1123_p0 }
  0x2f   : > { %p1131_p3 = pnand %p1130_p1, %p1124_p2 }
  0x31   : > { %1134 = shalt.err (!%p1131_p3)
}
  0x32   : > { %992 = dma.hbm_to_vmem [thread:$0]  (!%p1579_p6), %s1975_s1, 128, %s318_s18, [#allocation6]  }
  0x33   : > { %s1977_s3 = sld [smem:[#allocation27_spill]] }
  0x39   : > { %s1135_s28 = scalar_lea.hbm %s1977_s3, 128 }
  0x3a   : > { %p1136_p7 = scmp.ne.s32.totalorder %s1977_s3, %s1135_s28  ;;  %p1142_p1 = scmp.lt.u32.totalorder %s1135_s28, %s1977_s3 }
  0x3c   : > { %p1138_p9 = pnand %p1136_p7, %p1595_p8 }
  0x3e   : > { %p1139_p4 = pneg %p1138_p9 }
  0x40   : > { %p1144_p3 = pnand %p1142_p1, %p1139_p4 }
  0x42   : > { %1147 = shalt.err (!%p1144_p3)
}
  0x43   : > { %s1148_s18 = scalar_lea.vmem %s1583_s20, 128  ;;  %p1156_p13 = scmp.lt.s32.totalorder %s1583_s20, %s1583_s20 }
  0x44   : > { %p1149_p10 = scmp.ne.s32.totalorder %s1583_s20, %s1148_s18  ;;  %p1157_p0 = scmp.lt.s32.totalorder %s1148_s18, %s1148_s18 }
  0x46   : > { %p1151_p11 = pnand %p1149_p10, %p1595_p8  ;;  %p1158_p2 = por %p1157_p0, %p1156_p13 }
  0x48   : > { %p1152_p12 = pneg %p1151_p11 }
  0x4a   : > { %p1159_p5 = pnand %p1158_p2, %p1152_p12 }
  0x4c   : > { %1162 = shalt.err (!%p1159_p5)
}
  0x4d   : > { %998 = dma.hbm_to_vmem [thread:$0]  (!%p1579_p6), %s1977_s3, 128, %s1583_s20, [#allocation9]  }
  0x4e   : > { %s1163_s27 = scalar_lea.hbm %s1958_s5, 16 }
  0x4f   : > { %p1164_p7 = scmp.ne.s32.totalorder %s1958_s5, %s1163_s27  ;;  %p1170_p1 = scmp.lt.u32.totalorder %s1163_s27, %s1958_s5 }
  0x51   : > { %p1166_p9 = pnand %p1164_p7, %p1595_p8 }
  0x53   : > { %p1167_p4 = pneg %p1166_p9 }
  0x55   : > { %p1172_p3 = pnand %p1170_p1, %p1167_p4 }
  0x57   : > { %1175 = shalt.err (!%p1172_p3)
}
  0x58   : > { %s1176_s20 = scalar_lea.vmem %s1585_s23, 16  ;;  %s1183_s18 = scalar_lea.vmem %s1585_s23, 32 }
  0x59   : > { %p1177_p10 = scmp.ne.s32.totalorder %s1585_s23, %s1176_s20  ;;  %p1184_p13 = scmp.lt.s32.totalorder %s1585_s23, %s1585_s23 }
  0x5a   : > { %p1185_p0 = scmp.lt.s32.totalorder %s1183_s18, %s1176_s20 }
  0x5b   : > { %p1179_p11 = pnand %p1177_p10, %p1595_p8 }
  0x5c   : > { %p1186_p2 = por %p1185_p0, %p1184_p13 }
  0x5d   : > { %p1180_p12 = pneg %p1179_p11 }
  0x5f   : > { %p1187_p5 = pnand %p1186_p2, %p1180_p12 }
  0x61   : > { %1190 = shalt.err (!%p1187_p5)
}
  0x62   : > { %1004 = dma.hbm_to_vmem [thread:$0]  (!%p1579_p6), %s1958_s5, 16, %s1585_s23, [#allocation12]  }
  0x63   : > { %s1464_s25 = smov [#allocation7]   ;;  %s1465_s27 = smov [#allocation10]  }
  0x64   : > { %s330_s26 = sshll.u32 %s1464_s25, 4  ;;  %s354_s28 = sshll.u32 %s1465_s27, 4  ;;  %s331_s26 = int_to_ptr.vmem [resolvable:$true] %s330_s26  ;;  %s355_s28 = int_to_ptr.vmem [resolvable:$true] %s354_s28 }
  0x65   : > { %s1978_s2 = sld [smem:[#allocation26_spill]] }
  0x6b   : > { %s1191_s22 = scalar_lea.hbm %s1978_s2, 128 }
  0x6c   : > { %p1192_p7 = scmp.ne.s32.totalorder %s1978_s2, %s1191_s22  ;;  %p1198_p1 = scmp.lt.u32.totalorder %s1191_s22, %s1978_s2 }
  0x6e   : > { %p1194_p9 = pnand %p1192_p7, %p1595_p8 }
  0x70   : > { %p1195_p4 = pneg %p1194_p9 }
  0x72   : > { %p1200_p3 = pnand %p1198_p1, %p1195_p4 }
  0x74   : > { %1203 = shalt.err (!%p1200_p3)
}
  0x75   : > { %s1204_s23 = scalar_lea.vmem %s331_s26, 128  ;;  %p1212_p13 = scmp.lt.s32.totalorder %s331_s26, %s331_s26 }
  0x76   : > { %p1205_p10 = scmp.ne.s32.totalorder %s331_s26, %s1204_s23  ;;  %p1213_p0 = scmp.lt.s32.totalorder %s1204_s23, %s1204_s23 }
  0x78   : > { %p1207_p11 = pnand %p1205_p10, %p1595_p8  ;;  %p1214_p2 = por %p1213_p0, %p1212_p13 }
  0x7a   : > { %p1208_p12 = pneg %p1207_p11 }
  0x7c   : > { %p1215_p5 = pnand %p1214_p2, %p1208_p12 }
  0x7e   : > { %1218 = shalt.err (!%p1215_p5)
}
  0x7f   : > { %995 = dma.hbm_to_vmem [thread:$0]  (!%p1579_p6), %s1978_s2, 128, %s331_s26, [#allocation6]  }
  0x80   : > { %s1219_s17 = scalar_lea.hbm %s1957_s4, 16 }
  0x81   : > { %p1220_p7 = scmp.ne.s32.totalorder %s1957_s4, %s1219_s17  ;;  %p1226_p1 = scmp.lt.u32.totalorder %s1219_s17, %s1957_s4 }
  0x83   : > { %p1222_p9 = pnand %p1220_p7, %p1595_p8 }
  0x85   : > { %p1223_p4 = pneg %p1222_p9 }
  0x87   : > { %p1228_p3 = pnand %p1226_p1, %p1223_p4 }
  0x89   : > { %1231 = shalt.err (!%p1228_p3)
}
  0x8a   : > { %s1232_s9 = scalar_lea.vmem %s355_s28, 16  ;;  %s1239_s26 = scalar_lea.vmem %s355_s28, 32 }
  0x8b   : > { %p1233_p10 = scmp.ne.s32.totalorder %s355_s28, %s1232_s9  ;;  %p1240_p13 = scmp.lt.s32.totalorder %s355_s28, %s355_s28 }
  0x8c   : > { %p1241_p0 = scmp.lt.s32.totalorder %s1239_s26, %s1232_s9 }
  0x8d   : > { %p1235_p11 = pnand %p1233_p10, %p1595_p8 }
  0x8e   : > { %p1242_p2 = por %p1241_p0, %p1240_p13 }
  0x8f   : > { %p1236_p12 = pneg %p1235_p11 }
  0x91   : > { %p1243_p5 = pnand %p1242_p2, %p1236_p12 }
  0x93   : > { %1246 = shalt.err (!%p1243_p5)
}
  0x94   : > { %1001 = dma.hbm_to_vmem [thread:$0]  (!%p1579_p6), %s1957_s4, 16, %s355_s28, [#allocation9]  }
  0x95   : > { %s1466_s25 = smov [#allocation13]   ;;  %s1247_s19 = scalar_lea.hbm %s1959_s6, 256 }
  0x96   : > { %s375_s1 = sshll.u32 %s1466_s25, 4  ;;  %p1248_p7 = scmp.ne.s32.totalorder %s1959_s6, %s1247_s19  ;;  %s376_s1 = int_to_ptr.vmem [resolvable:$true] %s375_s1 }
  0x97   : > { %p1254_p1 = scmp.lt.u32.totalorder %s1247_s19, %s1959_s6 }
  0x98   : > { %p1250_p9 = pnand %p1248_p7, %p1595_p8 }
  0x9a   : > { %p1251_p4 = pneg %p1250_p9 }
  0x9c   : > { %p1256_p3 = pnand %p1254_p1, %p1251_p4 }
  0x9e   : > { %1259 = shalt.err (!%p1256_p3)
}
  0x9f   : > { %s1260_s28 = scalar_lea.vmem %s376_s1, 256  ;;  %p1268_p13 = scmp.lt.s32.totalorder %s376_s1, %s376_s1 }
  0xa0   : > { %p1261_p10 = scmp.ne.s32.totalorder %s376_s1, %s1260_s28  ;;  %p1269_p0 = scmp.lt.s32.totalorder %s1260_s28, %s1260_s28 }
  0xa2   : > { %p1263_p11 = pnand %p1261_p10, %p1595_p8  ;;  %p1270_p2 = por %p1269_p0, %p1268_p13 }
  0xa4   : > { %p1264_p12 = pneg %p1263_p11 }
  0xa6   : > { %p1271_p5 = pnand %p1270_p2, %p1264_p12 }
  0xa8   : > { %1274 = shalt.err (!%p1271_p5)
}
  0xa9   : > { %s1467_s26 = smov 64   ;;  %s1468_s29 = smov 4  }
  0xaa   : > { %1007 = dma.hbm_to_vmem [thread:$0]  (!%p1579_p6), %s1959_s6, 256, %s376_s1, [#allocation12], %s1467_s26, %s1467_s26, %s1468_s29  }
  0xab   : > { %s1966_s25 = sadd.s32 4294967294, %s1459_s14   ;;  %s41_s27 = sadd.s32 1, %s1455_s13 }
  0xac   : > { %p42_p8 = scmp.ge.s32.totalorder %s41_s27, 2  ;;  %s53_s17 = sadd.s32 1, %s1447_s11 }
  0xad   : > { %p60_p7 = scmp.ne.s32.totalorder %s1447_s11, %s1443_s10  ;;  %p61_p9 = scmp.eq.s32.totalorder %s1459_s14, 0 }
  0xae   : > { %s2004_s27 = smov (%p42_p8, %s41_s27), 0  ;;  %p66_p1 = scmp.ne.s32.totalorder %s1443_s10, %s1439_s30 }
  0xaf   : > { %p1720_p4 = por %p61_p9, %p60_p7  ;;  %s48_s1 = ssub.s32 %s1455_s13, %s2004_s27 }
  0xb0   : > { %p233_p6 = scmp.eq.s32.totalorder %s1565_s15, 1  ;;  %p51_p3 = scmp.eq.s32.totalorder %s48_s1, 0 }
  0xb1   : > { %p1980_p10 = scmp.eq.s32.totalorder %s1565_s15, 0  ;;  %p239_p13 = scmp.eq.s32.totalorder %s1966_s25, 1 }
  0xb2   : > { %p1735_p12 = por %p233_p6, %p60_p7  ;;  %p1028_p2 = scmp.lt.s32.totalorder %s1459_s14, 2 }
  0xb3   : > { %p1731_p11 = por %p1980_p10, %p66_p1  ;;  %p1744_p0 = por %p239_p13, %p66_p1 }
  0xb4   : > { %s1982_s22 = scalar_select %p1735_p12, 1, 0 }
  0xb5   : > { %s1742_s20 = scalar_select %p51_p3, %s1447_s11, %s53_s17  }
  0xb6   : > { %s1983_s18 = scalar_select %p1744_p0, 1, 0 }
  0xb7   : > { %s389_s9 = sand.u32 1, %s1447_s11   ;;  %s917_s28 = sshll.u32 %s1455_s13, 7 }
  0xb8   : > { %s916_s26 = sshll.u32 %s389_s9, 3  ;;  %s1984_s0 = sld [smem:[#allocation24_spill]] }
  0xb9   : > { %s393_s1 = scalar_lea.vmem [#allocation2], %s916_s26  ;;  %p1758_p5 = pnand %p1028_p2, %p1720_p4 }
  0xba   : > { %s401_s17 = sshll.u32 %s393_s1, 4  ;;  %s390_s2 = scalar_lea.sflag [#allocation3], %s389_s9  ;;  %s1762_s17 = int_to_ptr.vmem [resolvable:$true] %s401_s17 }
  0xbb   : > { %p1277_p7 = pneg %p1758_p5 }
  0xbe   : > { %s1754_s24 = scalar_lea.hbm %s1984_s0, %s917_s28  ;;  %s1280_s21 = scalar_lea.hbm %s1984_s0, 256 }
  0xbf   : > { %s1275_s3 = scalar_lea.hbm %s1754_s24, 128  ;;  %p1281_p4 = scmp.lt.u32.totalorder %s1754_s24, %s1984_s0 }
  0xc0   : > { %p1276_p8 = scmp.ne.s32.totalorder %s1754_s24, %s1275_s3  ;;  %p1282_p6 = scmp.lt.u32.totalorder %s1280_s21, %s1275_s3 }
  0xc1   : > { %p1284_p10 = scmp.lt.u32.totalorder %s1275_s3, %s1754_s24 }
  0xc2   : > { %p1278_p9 = pnand %p1277_p7, %p1276_p8  ;;  %p1283_p3 = por %p1282_p6, %p1281_p4 }
  0xc4   : > { %p1279_p1 = pneg %p1278_p9  ;;  %p1285_p13 = por %p1284_p10, %p1283_p3 }
  0xc6   : > { %p1286_p2 = pnand %p1285_p13, %p1279_p1 }
  0xc8   : > { %1289 = shalt.err (!%p1286_p2)
}
  0xc9   : > { %s1290_s9 = scalar_lea.vmem %s1762_s17, 128  ;;  %s1469_s1 = smov [#allocation2]  }
  0xca   : > { %p1291_p8 = scmp.ne.s32.totalorder %s1762_s17, %s1290_s9  ;;  %s1295_s28 = sshll.u32 %s1469_s1, 4  ;;  %s1296_s28 = int_to_ptr.vmem [resolvable:$false] %s1295_s28 }
  0xcb   : > { %s1297_s26 = scalar_lea.vmem %s1296_s28, 256  ;;  %p1298_p12 = scmp.lt.s32.totalorder %s1762_s17, %s1296_s28 }
  0xcc   : > { %p1293_p9 = pnand %p1291_p8, %p1277_p7  ;;  %p1299_p4 = scmp.lt.s32.totalorder %s1297_s26, %s1290_s9 }
  0xce   : > { %p1294_p0 = pneg %p1293_p9  ;;  %p1300_p6 = por %p1299_p4, %p1298_p12 }
  0xd0   : > { %p1301_p3 = pnand %p1300_p6, %p1294_p0 }
  0xd2   : > { %1304 = shalt.err (!%p1301_p3)
}
  0xd3   : > { %1011 = dma.hbm_to_vmem [thread:$0]  (!%p1758_p5), %s1754_s24, 128, %s1762_s17, %s390_s2  }
  0xd4   : > { %p1986_p1 = scmp.ne.s32.totalorder %s1973_s16, 0 }
  0xd5   : > { %s1792_s3 = sand.u32 (!%p1986_p1), 1, %s1443_s10  }
  0xd6   : > { %410 = sbr.rel (%p1986_p1) target bundleno = 1156 (0x484), region = 48  ;;  %s919_s21 = sshll.u32 (!%p1986_p1), %s1792_s3, 3 }
  0xd7   : > { %s413_s29 = scalar_lea.sflag (!%p1986_p1), [#allocation3], %s1792_s3  ;;  %s416_s23 = scalar_lea.vmem (!%p1986_p1), [#allocation2], %s919_s21 }
  0xdd   : > { %1414 = dma.done.wait (%p1731_p11), %s413_s29, 128  }
  0xde   : > { %1416 = vsyncadd (%p1731_p11), %s413_s29, 4294967168  ;;  %p1987_p12 = scmp.eq.s32.totalorder %s1565_s15, 0 }
  0xe0   : > { %1418 = dma.done.wait (%p1987_p12), [#allocation6], 256   ;;  %p1988_p0 = pmov %p1987_p12 }
  0xe2   : > { %1420 = vsyncadd (%p1988_p0), [#allocation6], 4294967040  ;;  %p1989_p5 = pmov %p1988_p0 }
  0xe3   : > { %p1990_p7 = pmov %p1988_p0 }
  0xe4   : > { %1422 = dma.done.wait (%p1989_p5), [#allocation9], 144  }
  0xe5   : > { %1424 = vsyncadd (%p1990_p7), [#allocation9], 4294967152  ;;  %p1991_p10 = pmov %p1988_p0 }
  0xe6   : > { %p1992_p13 = pmov %p1988_p0 }
  0xe7   : > { %1426 = dma.done.wait (%p1991_p10), [#allocation12], 272  }
  0xe8   : > { %1428 = vsyncadd (%p1992_p13), [#allocation12], 4294967024  ;;  %vm487_vm0 = vcmask 261120   ;;  %v486_v0 = vld [vmem:[%s416_s23] sm:$0xff]  ;;  %v1470_v8 = vmov 0.0   ;;  %vm1471_vm1 = vmmov 0  }
  0xe9   : > { %v488_v1 = vsel %vm487_vm0, %v486_v0, 0.0  ;;  %v1103_v7 = vld [vmem:[#allocation13] sm:$0xff]   ;;  %949 = vmatprep.subr.bf16.mxu0 %v1470_v8  ;;  %953 = vmatprep.mubr.msk.bf16.mxu0 %vm1471_vm1, %v1470_v8  ;;  %v1104_v9 = vld [vmem:[#allocation13 + $0x8] sm:$0xff]   ;;  %v929_v14 = vld [vmem:[#allocation10] ss:$0 sm:$0xff]  ;;  %s1472_s2 = smov 97  }
  0xea   : > { %489 = vadd.xlane.f32.xlu0 %v488_v1  ;;  %950 = vmatpush3.bf16.msra.mxu0 %v1103_v7  ;;  %v930_v16 = vld [vmem:[#allocation11] ss:$0 sm:$0xff]  ;;  %v578_v20 = vld [vmem:[#allocation5] sm:$0xff]  ;;  %s1473_s16 = smov 127   ;;  %s1474_s25 = smov 95   ;;  %vm588_vm2 = vcmask 252928  }
  0xeb   : > { %951 = vmatprep.subr.bf16.mxu0 %v1470_v8  ;;  %s1475_s19 = smov 65   ;;  %s1476_s24 = smov 32   ;;  %v579_v27 = vld [vmem:[#allocation7] sm:$0xff]  ;;  %vm596_vm3 = vcmask 7168   ;;  %v580_v31 = vld [vmem:[#allocation8] sm:$0xff]  ;;  %vm604_vm4 = vcmask 257024  }
  0xec   : > { %s1477_s17 = smov 31   ;;  %s1478_s9 = smov 1  }
  0xed   : > { %s1479_s1 = smov 64   ;;  %s1480_s28 = smov 96  }
  0xee   : > { %952 = vmatpush3.bf16.msra.mxu0 %v1104_v9  ;;  %s1819_s26 = sshll.u32 %s1792_s3, 2  ;;  %s1823_s21 = sshll.u32 %s1451_s12, 6 }
  0xef   : > { %s470_s29 = scalar_lea.vmem [#allocation14], %s1819_s26  ;;  %s648_s12 = scalar_lea.sflag [#allocation4], %s1792_s3 }
  0xf0   : > { %s672_s23 = sshll.u32 %s470_s29, 4  ;;  %p1993_p2 = scmp.ne.s32.totalorder %s1982_s22, 0  ;;  %s1836_s23 = int_to_ptr.vmem [resolvable:$true] %s672_s23 }
 0x177   : > { %v490_v2 = vpop.xlane.xlu0 %489 }
 0x178   : > { %v492_v3 = vmul.f32 0.03125, %v490_v2 }
 0x17a   : > { %v493_v4 = vsub.f32 %v486_v0, %v492_v3 }
 0x17c   : > { %v494_v5 = vmul.f32 %v493_v4, %v493_v4 }
 0x17e   : > { %v495_v6 = vsel %vm487_vm0, %v494_v5, 0.0 }
 0x17f   : > { %496 = vadd.xlane.f32.xlu0 %v495_v6 }
 0x20c   : > { %v497_v10 = vpop.xlane.xlu0 %496 }
 0x20d   : > { %v498_v11 = vmul.f32 0.03125, %v497_v10 }
 0x20f   : > { %v499_v12 = vadd.f32 1e-05, %v498_v11 }
 0x211   : > { %1105 = vrsqrt.f32 %v499_v12 }
 0x21b   : > { %v1106_v13 = vpop.eup %1105 }
 0x21c   : > { %v501_v15 = vmul.f32 %v1106_v13, %v493_v4 }
 0x21e   : > { %v509_v17 = vmul.f32 %v929_v14, %v501_v15 }
 0x220   : > { %v517_v18 = vadd.f32 %v930_v16, %v509_v17 }
 0x222   : > { %v518_v19 = vpack.c.bf16 %v517_v18, %v517_v18 }
 0x224   : > { %954 = vmatmul.mubr.msk.bf16.vlgmr.msra.gmra.mrb[0].mxu0 %vm487_vm0, %v518_v19 }
 0x2f7   : > { %v572_v21 = vpop.f32.mrb[0].mxu0 }
 0x2f8   : > { %590 = vrot.lane.b32.xlu0 %v572_v21, %s1472_s2  ;;  %582 = vrot.lane.b32.xlu1 %v572_v21, %s1473_s16  ;;  %v955_v22 = vpop.f32.mrb[1].mxu0  ;;  %v598_v23 = vmul.f32 %v578_v20, %v572_v21  ;;  %v945_v36 = vpack.c.bf16 %v572_v21, %v572_v21  ;;  %s484_s2 = scalar_lea.vmem [#allocation17], %s1819_s26 }
 0x2f9   : > { %v575_v24 = vpop.f32.mrb[2].mxu0 }
 0x2fa   : > { %v956_v25 = vpop.f32.mrb[3].mxu0 }
 0x2fc   : > { %606 = vrot.lane.b32.xlu1 %v572_v21, %s1474_s25 }
 0x300   : > { %610 = vrot.lane.b32.xlu1 %v572_v21, %s1475_s19  ;;  %s1834_s19 = scalar_lea.hbm %s1960_s7, %s1823_s21 }
 0x304   : > { %615 = vrot.lane.b32.xlu1 %v578_v20, %s1476_s24 }
 0x36a   : > { %v583_v26 = vpop.permute.xlu1 %582  ;;  %v591_v32 = vpop.permute.xlu0 %590 }
 0x36e   : > { %v607_v28 = vpop.permute.xlu1 %606 }
 0x36f   : > { %v609_v29 = vsel %vm588_vm2, %v607_v28, %v583_v26 }
 0x370   : > { %v619_v30 = vmul.f32 %v609_v29, %v579_v27 }
 0x372   : > { %621 = vrot.lane.b32.xlu1 %v619_v30, %s1476_s24  ;;  %v611_v33 = vpop.permute.xlu1 %610 }
 0x373   : > { %v613_v34 = vsel %vm596_vm3, %v611_v33, %v591_v32 }
 0x374   : > { %v625_v35 = vmul.f32 %v613_v34, %v580_v31 }
 0x376   : > { %627 = vrot.lane.b32.xlu1 %v625_v35, %s1476_s24  ;;  %v616_v37 = vpop.permute.xlu1 %615  ;;  %s1305_s24 = scalar_lea.vmem %s1836_s23, 64 }
 0x377   : > { %v618_v39 = vmul.f32 %v616_v37, %v572_v21  ;;  %p1306_p11 = scmp.ne.s32.totalorder %s1836_s23, %s1305_s24 }
 0x379   : > { %p1307_p8 = pnand %p1306_p11, %p1993_p2 }
 0x37a   : > { %585 = vrot.lane.b32.xlu1 %v572_v21, %s1477_s17  ;;  %s1481_s17 = smov [#allocation14]  }
 0x37b   : > { %p1308_p9 = pneg %p1307_p8 }
 0x37e   : > { %593 = vrot.lane.b32.xlu1 %v572_v21, %s1478_s9  ;;  %s1309_s9 = sshll.u32 %s1481_s17, 4  ;;  %s1310_s9 = int_to_ptr.vmem [resolvable:$false] %s1309_s9 }
 0x37f   : > { %p1312_p4 = scmp.lt.s32.totalorder %s1836_s23, %s1310_s9 }
 0x382   : > { %643 = vrot.lane.b32.xlu1 %v945_v36, %s1479_s1  ;;  %s1311_s1 = scalar_lea.vmem %s1310_s9, 128 }
 0x383   : > { %p1313_p6 = scmp.lt.s32.totalorder %s1311_s1, %s1305_s24 }
 0x385   : > { %p1314_p3 = por %p1313_p6, %p1312_p4 }
 0x387   : > { %p1315_p1 = pnand %p1314_p3, %p1308_p9 }
 0x3e4   : > { %v622_v38 = vpop.permute.xlu1 %621 }
 0x3e5   : > { %v624_v40 = vadd.f32 %v622_v38, %v618_v39 }
 0x3e8   : > { %v628_v41 = vpop.permute.xlu1 %627 }
 0x3e9   : > { %v630_v42 = vadd.f32 %v628_v41, %v624_v40 }
 0x3eb   : > { %v944_v43 = vpack.c.bf16 %v630_v42, %v630_v42 }
 0x3ec   : > { %v586_v44 = vpop.permute.xlu1 %585 }
 0x3ed   : > { %v589_v45 = vsel %vm588_vm2, %v583_v26, %v586_v44  ;;  %635 = vrot.lane.b32.xlu0 %v944_v43, %s1480_s28 }
 0x3ee   : > { %v599_v46 = vmul.f32 %v589_v45, %v579_v27 }
 0x3f0   : > { %v594_v47 = vpop.permute.xlu1 %593  ;;  %v600_v49 = vadd.f32 %v599_v46, %v598_v23 }
 0x3f1   : > { %v597_v48 = vsel %vm596_vm3, %v591_v32, %v594_v47 }
 0x3f2   : > { %v601_v50 = vmul.f32 %v597_v48, %v580_v31 }
 0x3f4   : > { %v602_v51 = vadd.f32 %v601_v50, %v600_v49  ;;  %v644_v52 = vpop.permute.xlu1 %643 }
 0x3f5   : > { %646 = vst.msk [vmem:[%s484_s2] sm:$0xf] %vm604_vm4, %v644_v52 }
 0x3f6   : > { %v603_v53 = vpack.c.bf16 %v602_v51, %v602_v51 }
 0x3f8   : > { %605 = vst.msk [vmem:[%s470_s29] sm:$0xf] %vm604_vm4, %v603_v53 }
 0x3f9   : > { %1318 = shalt.err (!%p1315_p1)
}
 0x3fa   : > { %s1319_s3 = scalar_lea.hbm %s1834_s19, 64  ;;  %s1323_s16 = scalar_lea.hbm %s1960_s7, 128 }
 0x3fb   : > { %p1320_p12 = scmp.ne.s32.totalorder %s1834_s19, %s1319_s3  ;;  %p1324_p7 = scmp.lt.u32.totalorder %s1834_s19, %s1960_s7 }
 0x3fc   : > { %p1325_p10 = scmp.lt.u32.totalorder %s1323_s16, %s1319_s3  ;;  %p1327_p11 = scmp.lt.u32.totalorder %s1319_s3, %s1834_s19 }
 0x3fd   : > { %p1321_p0 = pnand %p1320_p12, %p1993_p2 }
 0x3fe   : > { %p1326_p13 = por %p1325_p10, %p1324_p7 }
 0x3ff   : > { %p1322_p5 = pneg %p1321_p0 }
 0x400   : > { %p1328_p8 = por %p1327_p11, %p1326_p13 }
 0x402   : > { %p1329_p9 = pnand %p1328_p8, %p1322_p5 }
 0x404   : > { %1332 = shalt.err (!%p1329_p9)
}
 0x405   : > { %983 = dma.vmem_to_hbm [thread:$0]  (%p1993_p2), %s1836_s23, 64, %s1834_s19, %s648_s12  }
 0x406   : > { %s652_s24 = sand.u32 1, %s1565_s15   ;;  %s477_s9 = scalar_lea.vmem [#allocation15], %s1819_s26 }
 0x407   : > { %s686_s1 = sshll.u32 %s477_s9, 4  ;;  %s700_s28 = sshll.u32 %s484_s2, 4  ;;  %s1871_s1 = int_to_ptr.vmem [resolvable:$true] %s686_s1  ;;  %s1879_s28 = int_to_ptr.vmem [resolvable:$true] %s700_s28 }
 0x408   : > { %s1869_s16 = scalar_lea.hbm %s1961_s8, %s1823_s21  ;;  %s1994_s0 = sld [smem:[#allocation28_spill]] }
 0x409   : > { %s1882_s15 = scalar_lea.sflag [#allocation16], %s652_s24  ;;  %s1333_s26 = scalar_lea.vmem %s1871_s1, 64 }
 0x40a   : > { %p1334_p4 = scmp.ne.s32.totalorder %s1871_s1, %s1333_s26  ;;  %s1482_s2 = smov [#allocation15]  }
 0x40b   : > { %s1337_s19 = sshll.u32 %s1482_s2, 4  ;;  %s1338_s19 = int_to_ptr.vmem [resolvable:$false] %s1337_s19 }
 0x40c   : > { %p1335_p6 = pnand %p1334_p4, %p1993_p2  ;;  %s1339_s12 = scalar_lea.vmem %s1338_s19, 128 }
 0x40d   : > { %p1340_p1 = scmp.lt.s32.totalorder %s1871_s1, %s1338_s19  ;;  %p1341_p12 = scmp.lt.s32.totalorder %s1339_s12, %s1333_s26 }
 0x40e   : > { %s1877_s23 = scalar_lea.hbm %s1994_s0, %s1823_s21  ;;  %p1336_p3 = pneg %p1335_p6 }
 0x40f   : > { %p1342_p0 = por %p1341_p12, %p1340_p1 }
 0x411   : > { %p1343_p5 = pnand %p1342_p0, %p1336_p3 }
 0x45f   : > { %v636_v54 = vpop.permute.xlu0 %635 }
 0x460   : > { %638 = vst.msk [vmem:[%s477_s9] sm:$0xf] %vm604_vm4, %v636_v54 }
 0x461   : > { %1346 = shalt.err (!%p1343_p5)
}
 0x462   : > { %s1347_s21 = scalar_lea.hbm %s1869_s16, 64  ;;  %s1351_s3 = scalar_lea.hbm %s1961_s8, 128 }
 0x463   : > { %p1348_p7 = scmp.ne.s32.totalorder %s1869_s16, %s1347_s21  ;;  %p1352_p11 = scmp.lt.u32.totalorder %s1869_s16, %s1961_s8 }
 0x464   : > { %p1353_p8 = scmp.lt.u32.totalorder %s1351_s3, %s1347_s21  ;;  %p1355_p4 = scmp.lt.u32.totalorder %s1347_s21, %s1869_s16 }
 0x465   : > { %p1349_p10 = pnand %p1348_p7, %p1993_p2 }
 0x466   : > { %p1354_p9 = por %p1353_p8, %p1352_p11 }
 0x467   : > { %p1350_p13 = pneg %p1349_p10 }
 0x468   : > { %p1356_p6 = por %p1355_p4, %p1354_p9 }
 0x46a   : > { %p1357_p3 = pnand %p1356_p6, %p1350_p13 }
 0x46c   : > { %1360 = shalt.err (!%p1357_p3)
}
 0x46d   : > { %984 = dma.vmem_to_hbm [thread:$0]  (%p1993_p2), %s1871_s1, 64, %s1869_s16, %s1882_s15  }
 0x46e   : > { %s1361_s17 = scalar_lea.vmem %s1879_s28, 64  ;;  %s1483_s26 = smov [#allocation17]  }
 0x46f   : > { %p1362_p1 = scmp.ne.s32.totalorder %s1879_s28, %s1361_s17  ;;  %s1365_s2 = sshll.u32 %s1483_s26, 4  ;;  %s1366_s2 = int_to_ptr.vmem [resolvable:$false] %s1365_s2 }
 0x470   : > { %s1367_s19 = scalar_lea.vmem %s1366_s2, 128  ;;  %p1368_p5 = scmp.lt.s32.totalorder %s1879_s28, %s1366_s2 }
 0x471   : > { %p1363_p12 = pnand %p1362_p1, %p1993_p2  ;;  %p1369_p7 = scmp.lt.s32.totalorder %s1367_s19, %s1361_s17 }
 0x473   : > { %p1364_p0 = pneg %p1363_p12  ;;  %p1370_p10 = por %p1369_p7, %p1368_p5 }
 0x475   : > { %p1371_p13 = pnand %p1370_p10, %p1364_p0 }
 0x477   : > { %1374 = shalt.err (!%p1371_p13)
}
 0x478   : > { %s1375_s1 = scalar_lea.hbm %s1877_s23, 64  ;;  %s1379_s21 = scalar_lea.hbm %s1994_s0, 128 }
 0x479   : > { %p1376_p11 = scmp.ne.s32.totalorder %s1877_s23, %s1375_s1  ;;  %p1380_p4 = scmp.lt.u32.totalorder %s1877_s23, %s1994_s0 }
 0x47a   : > { %p1381_p6 = scmp.lt.u32.totalorder %s1379_s21, %s1375_s1  ;;  %p1383_p1 = scmp.lt.u32.totalorder %s1375_s1, %s1877_s23 }
 0x47b   : > { %p1377_p8 = pnand %p1376_p11, %p1993_p2 }
 0x47c   : > { %p1382_p3 = por %p1381_p6, %p1380_p4 }
 0x47d   : > { %p1378_p9 = pneg %p1377_p8 }
 0x47e   : > { %p1384_p12 = por %p1383_p1, %p1382_p3 }
 0x480   : > { %p1385_p0 = pnand %p1384_p12, %p1378_p9 }
 0x482   : > { %1388 = shalt.err (!%p1385_p0)
}
 0x483   : > { %985 = dma.vmem_to_hbm [thread:$0]  (%p1993_p2), %s1879_s28, 64, %s1877_s23, %s1882_s15  }
 0x484 PF: > { %s712_s3 = sand.u32 1, %s1439_s30   ;;  %p1995_p5 = scmp.ne.s32.totalorder %s1983_s18, 0 }
 0x485   : > { %p1996_p7 = scmp.ge.s32.totalorder %s1459_s14, 2  ;;  %s713_s29 = scalar_lea.sflag [#allocation4], %s712_s3 }
 0x487   : > { %p1013_p10 = pnand %p1996_p7, %p1995_p5 }
 0x489   : > { %1430 = dma.done.wait (!%p1013_p10), %s713_s29, 64  }
 0x48a   : > { %1432 = vsyncadd (!%p1013_p10), %s713_s29, 4294967232  ;;  %s1997_s25 = sadd.s32 4294967294, %s1459_s14  }
 0x48b   : > { %s721_s17 = sand.u32 1, %s1997_s25  }
 0x48c   : > { %s722_s26 = scalar_lea.sflag [#allocation16], %s721_s17 }
 0x48d   : > { %1434 = dma.done.wait (!%p1013_p10), %s722_s26, 128  }
 0x48e   : > { %1436 = vsyncadd (!%p1013_p10), %s722_s26, 4294967168  ;;  %s32_s14 = sadd.s32 1, %s1459_s14   ;;  %s1998_s30 = smov %s1443_s10 }
 0x48f   : > { %p29_p2 = scmp.ge.s32.totalorder %s32_s14, 4   ;;  %s1999_s10 = smov %s1447_s11 }
 0x490   : > { %s2000_s11 = smov %s1742_s20  ;;  %s2001_s12 = smov %s1455_s13 }
 0x491   : > { %s2002_s13 = smov %s2004_s27  ;;  %31 = sbr.rel (!%p29_p2) target bundleno = 17 (0x11), region = 152 }
 0x498   :  { %736 = vsyncpa [#allocation3], 1 }
 0x499   :  { %738 = vsyncpa [#allocation3 + $0x1], 1 }
 0x49a   :  { %739 = vsyncpa [#allocation6], 1 }
 0x49b   :  { %740 = vsyncpa [#allocation9], 1 }
 0x49c   :  { %741 = vsyncpa [#allocation12], 1 }
 0x49d   :  { %742 = vsyncpa [#allocation4], 1 }
 0x49e   :  { %744 = vsyncpa [#allocation4 + $0x1], 1 }
 0x49f   :  { %745 = vsyncpa [#allocation16], 1 }
 0x4a0   :  { %747 = vsyncpa [#allocation16 + $0x1], 1 }

</bundles_post_ra>
